<compile_context>
chip_gen: v5e
topology: v5e:2x2
jax: 0.10.0
libtpu: 0.0.40
codegen_flags: <defaults>
</compile_context>

<pallas_src>
import jax
import jax.numpy as jnp
from jax import lax
from jax.experimental import pallas as pl
from jax.experimental.pallas import tpu as pltpu

# ---------------------------------------------------------------------------
# Synthetic config (small shapes consistent with the module)
# ---------------------------------------------------------------------------
BSZ = 2
SEQ = 8
HIDDEN = 32
NUM_HEADS = 4
NUM_KV_HEADS = 2
HEAD_DIM = HIDDEN // NUM_HEADS          # 8
N_REP = NUM_HEADS // NUM_KV_HEADS       # 2
Q_SIZE = NUM_HEADS * HEAD_DIM           # 32
KV_SIZE = NUM_KV_HEADS * HEAD_DIM       # 16
QK_SIZE = Q_SIZE + KV_SIZE              # 48  (lanes that receive RoPE)
QKV_SIZE = Q_SIZE + 2 * KV_SIZE         # 64
HALF = HEAD_DIM // 2                    # 4
SCALE = HEAD_DIM ** (-0.5)
NEG_INF = -1e9                          # plain Python float (no captured consts)


# ---------------------------------------------------------------------------
# Single fused Pallas kernel
# ---------------------------------------------------------------------------
def _fused_attention_kernel(x_ref, cos_ref, sin_ref, wqkv_ref, bqkv_ref,
                            wo_ref, bo_ref, out_ref, attn_ref):
    x = x_ref[...]                                                  # (M, H)

    # One fused q|k|v projection on the MXU (single push instead of three).
    qkv = (jnp.dot(x, wqkv_ref[...], preferred_element_type=jnp.float32)
           + bqkv_ref[...])                                         # (M, 64)

    # ---- RoPE, applied once to the whole q|k slab (lanes [0, QK_SIZE)). ----
    # rotate_half within each 8-lane head == select between two full-width
    # lane rotations (XLU rolls).  Wrap-around lanes are never selected, and
    # head boundaries are multiples of HEAD_DIM, so this is exact.
    qk = qkv[:, :QK_SIZE]                                           # (M, 48)
    lane = lax.broadcasted_iota(jnp.int32, qk.shape, 1)
    first_half = (lane % HEAD_DIM) < HALF
    fwd = pltpu.roll(qk, HALF, axis=1)              # fwd[l] = qk[l - HALF]
    bwd = pltpu.roll(qk, QK_SIZE - HALF, axis=1)    # bwd[l] = qk[l + HALF]
    rot = jnp.where(first_half, -bwd, fwd)          # per-head rotate_half
    qk = qk * cos_ref[...] + rot * sin_ref[...]

    q = qk[:, :Q_SIZE] * SCALE    # fold softmax scale into q once (1 VPU mul)
    k = qk[:, Q_SIZE:]
    v = qkv[:, QK_SIZE:]

    # "Inverted" causal mask from the reference (masked_fill(triu(1)==0,-1e9)):
    # keep only strictly-future keys; the fully-masked last query row degrades
    # to a uniform distribution exactly like the reference softmax.
    # Built once for the group-stacked (N_REP*SEQ, SEQ) score tile.
    row = lax.broadcasted_iota(jnp.int32, (N_REP * SEQ, SEQ), 0) % SEQ
    col = lax.broadcasted_iota(jnp.int32, (N_REP * SEQ, SEQ), 1)
    keep = col > row

    dn_qkt = (((1,), (1,)), ((), ()))   # contract last dims of both (no .T)

    attn_rows = []
    ctx_rows = []
    for b in range(BSZ):
        r0 = b * SEQ
        ctx_heads = []
        for g in range(NUM_KV_HEADS):
            c0 = g * HEAD_DIM
            k_bg = k[r0:r0 + SEQ, c0:c0 + HEAD_DIM]                 # (T, D)
            v_bg = v[r0:r0 + SEQ, c0:c0 + HEAD_DIM]                 # (T, D)

            # Stack this kv-group's N_REP query heads along the query/sublane
            # axis so one QK^T and one P@V serve the whole group.
            q_grp = jnp.concatenate(
                [q[r0:r0 + SEQ,
                   (g * N_REP + r) * HEAD_DIM:(g * N_REP + r + 1) * HEAD_DIM]
                 for r in range(N_REP)],
                axis=0)                                             # (2T, D)

            s_grp = lax.dot_general(q_grp, k_bg, dn_qkt,
                                    preferred_element_type=jnp.float32)
            s_grp = jnp.where(keep, s_grp, NEG_INF)

            m = jnp.max(s_grp, axis=-1, keepdims=True)
            p = jnp.exp(s_grp - m)
            denom = jnp.sum(p, axis=-1, keepdims=True)
            # approx=False keeps attention rows exactly normalized; flip to
            # approx=True (EUP vrcp) at scale if downstream tolerates ~1e-3.
            p = p * pl.reciprocal(denom, approx=False)

            attn_rows.append(p)                                     # (2T, T)
            ctx_grp = jnp.dot(p, v_bg, preferred_element_type=jnp.float32)
            ctx_heads.extend(
                [ctx_grp[r * SEQ:(r + 1) * SEQ, :] for r in range(N_REP)])
        ctx_rows.append(jnp.concatenate(ctx_heads, axis=-1))        # (T, H)

    # Output projection hoisted out of the batch loop; ONE full-block store.
    ctx = jnp.concatenate(ctx_rows, axis=0)                         # (M, H)
    out = (jnp.dot(ctx, wo_ref[...], preferred_element_type=jnp.float32)
           + bo_ref[...])
    out_ref[...] = out.astype(out_ref.dtype)

    # ONE store of the attention weights; rows are (b, head, query)-flattened
    # (head = g*N_REP + r), the wrapper reshapes to (B, H, T, T).
    attn_ref[...] = jnp.concatenate(attn_rows, axis=0).astype(attn_ref.dtype)


def attention_forward(params, x, cos, sin):
    b, t, hdim = x.shape
    m = b * t
    x2 = x.reshape(m, hdim)

    # Layout plumbing (not compute): RoPE cos/sin depend only on position, so
    # tile them once to the q|k lane width so RoPE is a single elementwise pass
    # inside the kernel.  (cos/sin are batch-invariant by construction.)
    cos_qk = jnp.tile(cos[0], (b, NUM_HEADS + NUM_KV_HEADS))        # (m, 48)
    sin_qk = jnp.tile(sin[0], (b, NUM_HEADS + NUM_KV_HEADS))        # (m, 48)

    # Fused q|k|v weight / bias (single MXU projection in-kernel).
    w_qkv = jnp.concatenate([params["wq"], params["wk"], params["wv"]], axis=1)
    b_qkv = jnp.concatenate([params["bq"], params["bk"], params["bv"]], axis=1)

    def full_spec(shape):
        return pl.BlockSpec(shape, lambda i: (0,) * len(shape))

    out2, attn2 = pl.pallas_call(
        _fused_attention_kernel,
        out_shape=(jax.ShapeDtypeStruct((m, Q_SIZE), jnp.float32),
                   jax.ShapeDtypeStruct((b * NUM_HEADS * t, t), jnp.float32)),
        grid=(1,),
        in_specs=[
            full_spec((m, hdim)),            # x
            full_spec((m, QK_SIZE)),         # cos (tiled to q|k width)
            full_spec((m, QK_SIZE)),         # sin (tiled to q|k width)
            full_spec((hdim, QKV_SIZE)),     # w_qkv
            full_spec((1, QKV_SIZE)),        # b_qkv
            full_spec((HIDDEN, Q_SIZE)),     # wo
            full_spec((1, Q_SIZE)),          # bo
        ],
        out_specs=(full_spec((m, Q_SIZE)),
                   full_spec((b * NUM_HEADS * t, t))),
        compiler_params=pltpu.CompilerParams(
            dimension_semantics=("arbitrary",)),
    )(x2, cos_qk, sin_qk, w_qkv, b_qkv, params["wo"], params["bo"])

    return out2.reshape(b, t, Q_SIZE), attn2.reshape(b, NUM_HEADS, t, t)


# ---------------------------------------------------------------------------
# Parameters (deterministic init); weights stored (in, out), biases (1, out)
# ---------------------------------------------------------------------------
def init_params(key):
    def lin(k, d_in, d_out):
        kw, kb = jax.random.split(k)
        return (jax.random.normal(kw, (d_in, d_out), jnp.float32) * 0.05,
                jax.random.normal(kb, (1, d_out), jnp.float32) * 0.01)

    ks = jax.random.split(key, 4)
    wq, bq = lin(ks[0], HIDDEN, Q_SIZE)
    wk, bk = lin(ks[1], HIDDEN, KV_SIZE)
    wv, bv = lin(ks[2], HIDDEN, KV_SIZE)
    wo, bo = lin(ks[3], HIDDEN, Q_SIZE)
    return {"wq": wq, "bq": bq, "wk": wk, "bk": bk,
            "wv": wv, "bv": bv, "wo": wo, "bo": bo}


# ---------------------------------------------------------------------------
# Pure-JAX reference (matches the PyTorch module semantics)
# ---------------------------------------------------------------------------
def rotate_half(x):
    half = x.shape[-1] // 2
    return jnp.concatenate([-x[..., half:], x[..., :half]], axis=-1)


def apply_rotary_pos_emb(q, k, cos, sin):
    head_dim = q.shape[-1]
    cos = cos[..., :head_dim][:, None, :, :]   # unsqueeze_dim=1
    sin = sin[..., :head_dim][:, None, :, :]
    return q * cos + rotate_half(q) * sin, k * cos + rotate_half(k) * sin


def repeat_kv(x, n_rep):
    if n_rep == 1:
        return x
    return jnp.repeat(x, n_rep, axis=1)


def attention_forward_ref(params, x, cos, sin):
    b, t, _ = x.shape
    q = x @ params["wq"] + params["bq"][0]
    k = x @ params["wk"] + params["bk"][0]
    v = x @ params["wv"] + params["bv"][0]
    q = q.reshape(b, t, NUM_HEADS, HEAD_DIM).transpose(0, 2, 1, 3)
    k = k.reshape(b, t, NUM_KV_HEADS, HEAD_DIM).transpose(0, 2, 1, 3)
    v = v.reshape(b, t, NUM_KV_HEADS, HEAD_DIM).transpose(0, 2, 1, 3)
    q, k = apply_rotary_pos_emb(q, k, cos, sin)
    k = repeat_kv(k, N_REP)
    v = repeat_kv(v, N_REP)
    s = jnp.einsum("bhqd,bhkd->bhqk", q, k) * SCALE
    row = lax.broadcasted_iota(jnp.int32, (t, t), 0)
    col = lax.broadcasted_iota(jnp.int32, (t, t), 1)
    s = jnp.where(col > row, s, NEG_INF)
    attn = jax.nn.softmax(s, axis=-1)
    ctx = jnp.einsum("bhqk,bhkd->bhqd", attn, v)
    ctx = ctx.transpose(0, 2, 1, 3).reshape(b, t, NUM_HEADS * HEAD_DIM)
    out = ctx @ params["wo"] + params["bo"][0]
    return out, attn


# ---------------------------------------------------------------------------
# Main
# ---------------------------------------------------------------------------
if __name__ == "__main__":
    root = jax.random.PRNGKey(0)
    k_param, k_x = jax.random.split(root)

    params = init_params(k_param)
    x = jax.random.normal(k_x, (BSZ, SEQ, HIDDEN), jnp.float32)

    # RoPE-style position embeddings: (bsz, seq, head_dim)
    pos = jnp.arange(SEQ, dtype=jnp.float32)
    inv_freq = 1.0 / (10000.0 ** (
        jnp.arange(0, HEAD_DIM, 2, dtype=jnp.float32) / HEAD_DIM))
    freqs = pos[:, None] * inv_freq[None, :]
    emb = jnp.concatenate([freqs, freqs], axis=-1)            # (SEQ, HEAD_DIM)
    cos = jnp.broadcast_to(jnp.cos(emb), (BSZ, SEQ, HEAD_DIM))
    sin = jnp.broadcast_to(jnp.sin(emb), (BSZ, SEQ, HEAD_DIM))

    fwd = jax.jit(attention_forward)
    out, attn = fwd(params, x, cos, sin)
    jax.block_until_ready((out, attn))

    out_ref, attn_ref = attention_forward_ref(params, x, cos, sin)
    assert out.shape == (BSZ, SEQ, Q_SIZE)
    assert attn.shape == (BSZ, NUM_HEADS, SEQ, SEQ)
    assert bool(jnp.allclose(out, out_ref, atol=2e-3, rtol=2e-3)), "output mismatch"
    assert bool(jnp.allclose(attn, attn_ref, atol=2e-3, rtol=2e-3)), "attn mismatch"

    print("KERNEL_OK")
</pallas_src>

<mosaic_0001>
module attributes {stable_mosaic.version = 11 : i64} {
  func.func @_fused_attention_kernel(%arg0: i32, %arg1: memref<16x32xf32, #tpu.memory_space<vmem>>, %arg2: memref<16x48xf32, #tpu.memory_space<vmem>>, %arg3: memref<16x48xf32, #tpu.memory_space<vmem>>, %arg4: memref<32x64xf32, #tpu.memory_space<vmem>>, %arg5: memref<1x64xf32, #tpu.memory_space<vmem>>, %arg6: memref<32x32xf32, #tpu.memory_space<vmem>>, %arg7: memref<1x32xf32, #tpu.memory_space<vmem>>, %arg8: memref<16x32xf32, #tpu.memory_space<vmem>>, %arg9: memref<64x8xf32, #tpu.memory_space<vmem>>) attributes {dimension_semantics = [#tpu.dimension_semantics<arbitrary>], iteration_bounds = array<i64: 1>, scalar_prefetch = 0 : i64, scratch_operands = 0 : i64, tpu.core_type = #tpu.core_type<tc>, window_params = [{pipeline_mode = #tpu.pipeline_mode<synchronous>, transform_indices = @transform_0, window_bounds = array<i64: 16, 32>}, {pipeline_mode = #tpu.pipeline_mode<synchronous>, transform_indices = @transform_1, window_bounds = array<i64: 16, 48>}, {pipeline_mode = #tpu.pipeline_mode<synchronous>, transform_indices = @transform_2, window_bounds = array<i64: 16, 48>}, {pipeline_mode = #tpu.pipeline_mode<synchronous>, transform_indices = @transform_3, window_bounds = array<i64: 32, 64>}, {pipeline_mode = #tpu.pipeline_mode<synchronous>, transform_indices = @transform_4, window_bounds = array<i64: 1, 64>}, {pipeline_mode = #tpu.pipeline_mode<synchronous>, transform_indices = @transform_5, window_bounds = array<i64: 32, 32>}, {pipeline_mode = #tpu.pipeline_mode<synchronous>, transform_indices = @transform_6, window_bounds = array<i64: 1, 32>}, {pipeline_mode = #tpu.pipeline_mode<synchronous>, transform_indices = @transform_7, window_bounds = array<i64: 16, 32>}, {pipeline_mode = #tpu.pipeline_mode<synchronous>, transform_indices = @transform_8, window_bounds = array<i64: 64, 8>}]} {
    %c0 = arith.constant 0 : index
    %c0_0 = arith.constant 0 : index
    %0 = vector.load %arg1[%c0, %c0_0] : memref<16x32xf32, #tpu.memory_space<vmem>>, vector<16x32xf32>
    %c0_1 = arith.constant 0 : index
    %c0_2 = arith.constant 0 : index
    %1 = vector.load %arg4[%c0_1, %c0_2] : memref<32x64xf32, #tpu.memory_space<vmem>>, vector<32x64xf32>
    %cst = arith.constant dense<0.000000e+00> : vector<16x64xf32>
    %2 = tpu.matmul %0, %1, %cst {dimension_numbers = #tpu.dot_dimension_numbers<[1], [0], [0], [1], [0, 0, 1, 1], [], []>} : vector<16x32xf32>, vector<32x64xf32>, vector<16x64xf32> -> vector<16x64xf32>
    %c0_3 = arith.constant 0 : index
    %c0_4 = arith.constant 0 : index
    %3 = vector.load %arg5[%c0_3, %c0_4] : memref<1x64xf32, #tpu.memory_space<vmem>>, vector<1x64xf32>
    %4 = vector.broadcast %3 : vector<1x64xf32> to vector<16x64xf32>
    %5 = arith.addf %2, %4 : vector<16x64xf32>
    %6 = vector.extract_strided_slice %5 {offsets = [0, 0], sizes = [16, 48], strides = [1, 1]} : vector<16x64xf32> to vector<16x48xf32>
    %7 = tpu.iota {dimensions = array<i32: 1>} : vector<16x48xi32>
    %c8_i32 = arith.constant 8 : i32
    %c0_i32 = arith.constant 0 : i32
    %8 = arith.cmpi eq, %c8_i32, %c0_i32 : i32
    %c1_i32 = arith.constant 1 : i32
    %9 = arith.select %8, %c1_i32, %c8_i32 : i32
    %10 = vector.broadcast %9 : i32 to vector<16x48xi32>
    %11 = arith.remsi %7, %10 : vector<16x48xi32>
    %c0_i32_5 = arith.constant 0 : i32
    %12 = vector.broadcast %c0_i32_5 : i32 to vector<16x48xi32>
    %13 = arith.cmpi ne, %11, %12 : vector<16x48xi32>
    %c0_i32_6 = arith.constant 0 : i32
    %14 = vector.broadcast %c0_i32_6 : i32 to vector<16x48xi32>
    %15 = arith.cmpi slt, %11, %14 : vector<16x48xi32>
    %c0_i32_7 = arith.constant 0 : i32
    %16 = arith.cmpi slt, %9, %c0_i32_7 : i32
    %17 = vector.broadcast %16 : i1 to vector<16x48xi1>
    %18 = vector.broadcast %17 : vector<16x48xi1> to vector<16x48xi1>
    %19 = arith.xori %15, %18 : vector<16x48xi1>
    %20 = arith.andi %19, %13 : vector<16x48xi1>
    %21 = vector.broadcast %9 : i32 to vector<16x48xi32>
    %22 = arith.addi %11, %21 : vector<16x48xi32>
    %23 = arith.select %20, %22, %11 : vector<16x48xi1>, vector<16x48xi32>
    %c4_i32 = arith.constant 4 : i32
    %24 = vector.broadcast %c4_i32 : i32 to vector<16x48xi32>
    %25 = arith.cmpi slt, %23, %24 : vector<16x48xi32>
    %c4_i32_8 = arith.constant 4 : i32
    %26 = tpu.dynamic_rotate %6 by %c4_i32_8 dim 1 : vector<16x48xf32>, i32 -> vector<16x48xf32>
    %c44_i32 = arith.constant 44 : i32
    %27 = tpu.dynamic_rotate %6 by %c44_i32 dim 1 : vector<16x48xf32>, i32 -> vector<16x48xf32>
    %cst_9 = arith.constant 0.000000e+00 : f32
    %28 = vector.broadcast %cst_9 : f32 to vector<16x48xf32>
    %29 = arith.subf %28, %27 : vector<16x48xf32>
    %30 = arith.select %25, %29, %26 : vector<16x48xi1>, vector<16x48xf32>
    %c0_10 = arith.constant 0 : index
    %c0_11 = arith.constant 0 : index
    %31 = vector.load %arg2[%c0_10, %c0_11] : memref<16x48xf32, #tpu.memory_space<vmem>>, vector<16x48xf32>
    %32 = arith.mulf %6, %31 : vector<16x48xf32>
    %c0_12 = arith.constant 0 : index
    %c0_13 = arith.constant 0 : index
    %33 = vector.load %arg3[%c0_12, %c0_13] : memref<16x48xf32, #tpu.memory_space<vmem>>, vector<16x48xf32>
    %34 = arith.mulf %30, %33 : vector<16x48xf32>
    %35 = arith.addf %32, %34 : vector<16x48xf32>
    %36 = vector.extract_strided_slice %35 {offsets = [0, 0], sizes = [16, 32], strides = [1, 1]} : vector<16x48xf32> to vector<16x32xf32>
    %cst_14 = arith.constant 0.353553385 : f32
    %37 = vector.broadcast %cst_14 : f32 to vector<16x32xf32>
    %38 = arith.mulf %36, %37 : vector<16x32xf32>
    %39 = vector.extract_strided_slice %35 {offsets = [0, 32], sizes = [16, 16], strides = [1, 1]} : vector<16x48xf32> to vector<16x16xf32>
    %40 = vector.extract_strided_slice %5 {offsets = [0, 48], sizes = [16, 16], strides = [1, 1]} : vector<16x64xf32> to vector<16x16xf32>
    %41 = tpu.iota {dimensions = array<i32: 0>} : vector<16x8xi32>
    %c8_i32_15 = arith.constant 8 : i32
    %c0_i32_16 = arith.constant 0 : i32
    %42 = arith.cmpi eq, %c8_i32_15, %c0_i32_16 : i32
    %c1_i32_17 = arith.constant 1 : i32
    %43 = arith.select %42, %c1_i32_17, %c8_i32_15 : i32
    %44 = vector.broadcast %43 : i32 to vector<16x8xi32>
    %45 = arith.remsi %41, %44 : vector<16x8xi32>
    %c0_i32_18 = arith.constant 0 : i32
    %46 = vector.broadcast %c0_i32_18 : i32 to vector<16x8xi32>
    %47 = arith.cmpi ne, %45, %46 : vector<16x8xi32>
    %c0_i32_19 = arith.constant 0 : i32
    %48 = vector.broadcast %c0_i32_19 : i32 to vector<16x8xi32>
    %49 = arith.cmpi slt, %45, %48 : vector<16x8xi32>
    %c0_i32_20 = arith.constant 0 : i32
    %50 = arith.cmpi slt, %43, %c0_i32_20 : i32
    %51 = vector.broadcast %50 : i1 to vector<16x8xi1>
    %52 = vector.broadcast %51 : vector<16x8xi1> to vector<16x8xi1>
    %53 = arith.xori %49, %52 : vector<16x8xi1>
    %54 = arith.andi %53, %47 : vector<16x8xi1>
    %55 = vector.broadcast %43 : i32 to vector<16x8xi32>
    %56 = arith.addi %45, %55 : vector<16x8xi32>
    %57 = arith.select %54, %56, %45 : vector<16x8xi1>, vector<16x8xi32>
    %58 = tpu.iota {dimensions = array<i32: 1>} : vector<16x8xi32>
    %59 = arith.cmpi sgt, %58, %57 : vector<16x8xi32>
    %60 = vector.extract_strided_slice %39 {offsets = [0, 0], sizes = [8, 8], strides = [1, 1]} : vector<16x16xf32> to vector<8x8xf32>
    %61 = vector.extract_strided_slice %40 {offsets = [0, 0], sizes = [8, 8], strides = [1, 1]} : vector<16x16xf32> to vector<8x8xf32>
    %62 = vector.extract_strided_slice %38 {offsets = [0, 0], sizes = [8, 8], strides = [1, 1]} : vector<16x32xf32> to vector<8x8xf32>
    %63 = vector.extract_strided_slice %38 {offsets = [0, 8], sizes = [8, 8], strides = [1, 1]} : vector<16x32xf32> to vector<8x8xf32>
    %64 = tpu.concatenate %62, %63 in 0 : vector<8x8xf32>, vector<8x8xf32> -> vector<16x8xf32>
    %cst_21 = arith.constant dense<0.000000e+00> : vector<16x8xf32>
    %65 = tpu.matmul %64, %60, %cst_21 {dimension_numbers = #tpu.dot_dimension_numbers<[1], [1], [0], [0], [0, 0, 1, 0], [], []>} : vector<16x8xf32>, vector<8x8xf32>, vector<16x8xf32> -> vector<16x8xf32>
    %cst_22 = arith.constant -1.000000e+09 : f32
    %66 = vector.broadcast %cst_22 : f32 to vector<16x8xf32>
    %67 = arith.select %59, %65, %66 : vector<16x8xi1>, vector<16x8xf32>
    %cst_23 = arith.constant dense<0xFF800000> : vector<16xf32>
    %68 = vector.multi_reduction <maximumf>, %67, %cst_23 [1] : vector<16x8xf32> to vector<16xf32>
    %69 = vector.shape_cast %68 : vector<16xf32> to vector<16x1xf32>
    %70 = vector.broadcast %69 : vector<16x1xf32> to vector<16x8xf32>
    %71 = arith.subf %67, %70 : vector<16x8xf32>
    %72 = math.exp %71 : vector<16x8xf32>
    %cst_24 = arith.constant dense<0.000000e+00> : vector<16xf32>
    %73 = vector.multi_reduction <add>, %72, %cst_24 [1] : vector<16x8xf32> to vector<16xf32>
    %74 = vector.shape_cast %73 : vector<16xf32> to vector<16x1xf32>
    %75 = tpu.reciprocal %74 : vector<16x1xf32> -> vector<16x1xf32>
    %76 = vector.broadcast %75 : vector<16x1xf32> to vector<16x8xf32>
    %77 = arith.mulf %72, %76 : vector<16x8xf32>
    %cst_25 = arith.constant dense<0.000000e+00> : vector<16x8xf32>
    %78 = tpu.matmul %77, %61, %cst_25 {dimension_numbers = #tpu.dot_dimension_numbers<[1], [0], [0], [1], [0, 0, 1, 1], [], []>} : vector<16x8xf32>, vector<8x8xf32>, vector<16x8xf32> -> vector<16x8xf32>
    %79 = vector.extract_strided_slice %78 {offsets = [0, 0], sizes = [8, 8], strides = [1, 1]} : vector<16x8xf32> to vector<8x8xf32>
    %80 = vector.extract_strided_slice %78 {offsets = [8, 0], sizes = [8, 8], strides = [1, 1]} : vector<16x8xf32> to vector<8x8xf32>
    %81 = vector.extract_strided_slice %39 {offsets = [0, 8], sizes = [8, 8], strides = [1, 1]} : vector<16x16xf32> to vector<8x8xf32>
    %82 = vector.extract_strided_slice %40 {offsets = [0, 8], sizes = [8, 8], strides = [1, 1]} : vector<16x16xf32> to vector<8x8xf32>
    %83 = vector.extract_strided_slice %38 {offsets = [0, 16], sizes = [8, 8], strides = [1, 1]} : vector<16x32xf32> to vector<8x8xf32>
    %84 = vector.extract_strided_slice %38 {offsets = [0, 24], sizes = [8, 8], strides = [1, 1]} : vector<16x32xf32> to vector<8x8xf32>
    %85 = tpu.concatenate %83, %84 in 0 : vector<8x8xf32>, vector<8x8xf32> -> vector<16x8xf32>
    %cst_26 = arith.constant dense<0.000000e+00> : vector<16x8xf32>
    %86 = tpu.matmul %85, %81, %cst_26 {dimension_numbers = #tpu.dot_dimension_numbers<[1], [1], [0], [0], [0, 0, 1, 0], [], []>} : vector<16x8xf32>, vector<8x8xf32>, vector<16x8xf32> -> vector<16x8xf32>
    %cst_27 = arith.constant -1.000000e+09 : f32
    %87 = vector.broadcast %cst_27 : f32 to vector<16x8xf32>
    %88 = arith.select %59, %86, %87 : vector<16x8xi1>, vector<16x8xf32>
    %cst_28 = arith.constant dense<0xFF800000> : vector<16xf32>
    %89 = vector.multi_reduction <maximumf>, %88, %cst_28 [1] : vector<16x8xf32> to vector<16xf32>
    %90 = vector.shape_cast %89 : vector<16xf32> to vector<16x1xf32>
    %91 = vector.broadcast %90 : vector<16x1xf32> to vector<16x8xf32>
    %92 = arith.subf %88, %91 : vector<16x8xf32>
    %93 = math.exp %92 : vector<16x8xf32>
    %cst_29 = arith.constant dense<0.000000e+00> : vector<16xf32>
    %94 = vector.multi_reduction <add>, %93, %cst_29 [1] : vector<16x8xf32> to vector<16xf32>
    %95 = vector.shape_cast %94 : vector<16xf32> to vector<16x1xf32>
    %96 = tpu.reciprocal %95 : vector<16x1xf32> -> vector<16x1xf32>
    %97 = vector.broadcast %96 : vector<16x1xf32> to vector<16x8xf32>
    %98 = arith.mulf %93, %97 : vector<16x8xf32>
    %cst_30 = arith.constant dense<0.000000e+00> : vector<16x8xf32>
    %99 = tpu.matmul %98, %82, %cst_30 {dimension_numbers = #tpu.dot_dimension_numbers<[1], [0], [0], [1], [0, 0, 1, 1], [], []>} : vector<16x8xf32>, vector<8x8xf32>, vector<16x8xf32> -> vector<16x8xf32>
    %100 = vector.extract_strided_slice %99 {offsets = [0, 0], sizes = [8, 8], strides = [1, 1]} : vector<16x8xf32> to vector<8x8xf32>
    %101 = vector.extract_strided_slice %99 {offsets = [8, 0], sizes = [8, 8], strides = [1, 1]} : vector<16x8xf32> to vector<8x8xf32>
    %102 = tpu.concatenate %79, %80, %100, %101 in 1 : vector<8x8xf32>, vector<8x8xf32>, vector<8x8xf32>, vector<8x8xf32> -> vector<8x32xf32>
    %103 = vector.extract_strided_slice %39 {offsets = [8, 0], sizes = [8, 8], strides = [1, 1]} : vector<16x16xf32> to vector<8x8xf32>
    %104 = vector.extract_strided_slice %40 {offsets = [8, 0], sizes = [8, 8], strides = [1, 1]} : vector<16x16xf32> to vector<8x8xf32>
    %105 = vector.extract_strided_slice %38 {offsets = [8, 0], sizes = [8, 8], strides = [1, 1]} : vector<16x32xf32> to vector<8x8xf32>
    %106 = vector.extract_strided_slice %38 {offsets = [8, 8], sizes = [8, 8], strides = [1, 1]} : vector<16x32xf32> to vector<8x8xf32>
    %107 = tpu.concatenate %105, %106 in 0 : vector<8x8xf32>, vector<8x8xf32> -> vector<16x8xf32>
    %cst_31 = arith.constant dense<0.000000e+00> : vector<16x8xf32>
    %108 = tpu.matmul %107, %103, %cst_31 {dimension_numbers = #tpu.dot_dimension_numbers<[1], [1], [0], [0], [0, 0, 1, 0], [], []>} : vector<16x8xf32>, vector<8x8xf32>, vector<16x8xf32> -> vector<16x8xf32>
    %cst_32 = arith.constant -1.000000e+09 : f32
    %109 = vector.broadcast %cst_32 : f32 to vector<16x8xf32>
    %110 = arith.select %59, %108, %109 : vector<16x8xi1>, vector<16x8xf32>
    %cst_33 = arith.constant dense<0xFF800000> : vector<16xf32>
    %111 = vector.multi_reduction <maximumf>, %110, %cst_33 [1] : vector<16x8xf32> to vector<16xf32>
    %112 = vector.shape_cast %111 : vector<16xf32> to vector<16x1xf32>
    %113 = vector.broadcast %112 : vector<16x1xf32> to vector<16x8xf32>
    %114 = arith.subf %110, %113 : vector<16x8xf32>
    %115 = math.exp %114 : vector<16x8xf32>
    %cst_34 = arith.constant dense<0.000000e+00> : vector<16xf32>
    %116 = vector.multi_reduction <add>, %115, %cst_34 [1] : vector<16x8xf32> to vector<16xf32>
    %117 = vector.shape_cast %116 : vector<16xf32> to vector<16x1xf32>
    %118 = tpu.reciprocal %117 : vector<16x1xf32> -> vector<16x1xf32>
    %119 = vector.broadcast %118 : vector<16x1xf32> to vector<16x8xf32>
    %120 = arith.mulf %115, %119 : vector<16x8xf32>
    %cst_35 = arith.constant dense<0.000000e+00> : vector<16x8xf32>
    %121 = tpu.matmul %120, %104, %cst_35 {dimension_numbers = #tpu.dot_dimension_numbers<[1], [0], [0], [1], [0, 0, 1, 1], [], []>} : vector<16x8xf32>, vector<8x8xf32>, vector<16x8xf32> -> vector<16x8xf32>
    %122 = vector.extract_strided_slice %121 {offsets = [0, 0], sizes = [8, 8], strides = [1, 1]} : vector<16x8xf32> to vector<8x8xf32>
    %123 = vector.extract_strided_slice %121 {offsets = [8, 0], sizes = [8, 8], strides = [1, 1]} : vector<16x8xf32> to vector<8x8xf32>
    %124 = vector.extract_strided_slice %39 {offsets = [8, 8], sizes = [8, 8], strides = [1, 1]} : vector<16x16xf32> to vector<8x8xf32>
    %125 = vector.extract_strided_slice %40 {offsets = [8, 8], sizes = [8, 8], strides = [1, 1]} : vector<16x16xf32> to vector<8x8xf32>
    %126 = vector.extract_strided_slice %38 {offsets = [8, 16], sizes = [8, 8], strides = [1, 1]} : vector<16x32xf32> to vector<8x8xf32>
    %127 = vector.extract_strided_slice %38 {offsets = [8, 24], sizes = [8, 8], strides = [1, 1]} : vector<16x32xf32> to vector<8x8xf32>
    %128 = tpu.concatenate %126, %127 in 0 : vector<8x8xf32>, vector<8x8xf32> -> vector<16x8xf32>
    %cst_36 = arith.constant dense<0.000000e+00> : vector<16x8xf32>
    %129 = tpu.matmul %128, %124, %cst_36 {dimension_numbers = #tpu.dot_dimension_numbers<[1], [1], [0], [0], [0, 0, 1, 0], [], []>} : vector<16x8xf32>, vector<8x8xf32>, vector<16x8xf32> -> vector<16x8xf32>
    %cst_37 = arith.constant -1.000000e+09 : f32
    %130 = vector.broadcast %cst_37 : f32 to vector<16x8xf32>
    %131 = arith.select %59, %129, %130 : vector<16x8xi1>, vector<16x8xf32>
    %cst_38 = arith.constant dense<0xFF800000> : vector<16xf32>
    %132 = vector.multi_reduction <maximumf>, %131, %cst_38 [1] : vector<16x8xf32> to vector<16xf32>
    %133 = vector.shape_cast %132 : vector<16xf32> to vector<16x1xf32>
    %134 = vector.broadcast %133 : vector<16x1xf32> to vector<16x8xf32>
    %135 = arith.subf %131, %134 : vector<16x8xf32>
    %136 = math.exp %135 : vector<16x8xf32>
    %cst_39 = arith.constant dense<0.000000e+00> : vector<16xf32>
    %137 = vector.multi_reduction <add>, %136, %cst_39 [1] : vector<16x8xf32> to vector<16xf32>
    %138 = vector.shape_cast %137 : vector<16xf32> to vector<16x1xf32>
    %139 = tpu.reciprocal %138 : vector<16x1xf32> -> vector<16x1xf32>
    %140 = vector.broadcast %139 : vector<16x1xf32> to vector<16x8xf32>
    %141 = arith.mulf %136, %140 : vector<16x8xf32>
    %cst_40 = arith.constant dense<0.000000e+00> : vector<16x8xf32>
    %142 = tpu.matmul %141, %125, %cst_40 {dimension_numbers = #tpu.dot_dimension_numbers<[1], [0], [0], [1], [0, 0, 1, 1], [], []>} : vector<16x8xf32>, vector<8x8xf32>, vector<16x8xf32> -> vector<16x8xf32>
    %143 = vector.extract_strided_slice %142 {offsets = [0, 0], sizes = [8, 8], strides = [1, 1]} : vector<16x8xf32> to vector<8x8xf32>
    %144 = vector.extract_strided_slice %142 {offsets = [8, 0], sizes = [8, 8], strides = [1, 1]} : vector<16x8xf32> to vector<8x8xf32>
    %145 = tpu.concatenate %122, %123, %143, %144 in 1 : vector<8x8xf32>, vector<8x8xf32>, vector<8x8xf32>, vector<8x8xf32> -> vector<8x32xf32>
    %146 = tpu.concatenate %102, %145 in 0 : vector<8x32xf32>, vector<8x32xf32> -> vector<16x32xf32>
    %c0_41 = arith.constant 0 : index
    %c0_42 = arith.constant 0 : index
    %147 = vector.load %arg6[%c0_41, %c0_42] : memref<32x32xf32, #tpu.memory_space<vmem>>, vector<32x32xf32>
    %cst_43 = arith.constant dense<0.000000e+00> : vector<16x32xf32>
    %148 = tpu.matmul %146, %147, %cst_43 {dimension_numbers = #tpu.dot_dimension_numbers<[1], [0], [0], [1], [0, 0, 1, 1], [], []>} : vector<16x32xf32>, vector<32x32xf32>, vector<16x32xf32> -> vector<16x32xf32>
    %c0_44 = arith.constant 0 : index
    %c0_45 = arith.constant 0 : index
    %149 = vector.load %arg7[%c0_44, %c0_45] : memref<1x32xf32, #tpu.memory_space<vmem>>, vector<1x32xf32>
    %150 = vector.broadcast %149 : vector<1x32xf32> to vector<16x32xf32>
    %151 = arith.addf %148, %150 : vector<16x32xf32>
    %c0_46 = arith.constant 0 : index
    %c0_47 = arith.constant 0 : index
    %152 = vector.load %arg8[%c0_46, %c0_47] : memref<16x32xf32, #tpu.memory_space<vmem>>, vector<16x32xf32>
    tpu.vector_store %arg8[%c0_46, %c0_47], %151 {strides = array<i32>} : memref<16x32xf32, #tpu.memory_space<vmem>>, vector<16x32xf32>,
    %153 = tpu.concatenate %77, %98, %120, %141 in 0 : vector<16x8xf32>, vector<16x8xf32>, vector<16x8xf32>, vector<16x8xf32> -> vector<64x8xf32>
    %c0_48 = arith.constant 0 : index
    %c0_49 = arith.constant 0 : index
    %154 = vector.load %arg9[%c0_48, %c0_49] : memref<64x8xf32, #tpu.memory_space<vmem>>, vector<64x8xf32>
    tpu.vector_store %arg9[%c0_48, %c0_49], %153 {strides = array<i32>} : memref<64x8xf32, #tpu.memory_space<vmem>>, vector<64x8xf32>,
    return
  }
  func.func @transform_0(%arg0: i32) -> (i32, i32) {
    %c0_i32 = arith.constant 0 : i32
    %c0_i32_0 = arith.constant 0 : i32
    %c0_i32_1 = arith.constant 0 : i32
    return %c0_i32, %c0_i32_0 : i32, i32
  }
  func.func @transform_1(%arg0: i32) -> (i32, i32) {
    %c0_i32 = arith.constant 0 : i32
    %c0_i32_0 = arith.constant 0 : i32
    %c0_i32_1 = arith.constant 0 : i32
    return %c0_i32, %c0_i32_0 : i32, i32
  }
  func.func @transform_2(%arg0: i32) -> (i32, i32) {
    %c0_i32 = arith.constant 0 : i32
    %c0_i32_0 = arith.constant 0 : i32
    %c0_i32_1 = arith.constant 0 : i32
    return %c0_i32, %c0_i32_0 : i32, i32
  }
  func.func @transform_3(%arg0: i32) -> (i32, i32) {
    %c0_i32 = arith.constant 0 : i32
    %c0_i32_0 = arith.constant 0 : i32
    %c0_i32_1 = arith.constant 0 : i32
    return %c0_i32, %c0_i32_0 : i32, i32
  }
  func.func @transform_4(%arg0: i32) -> (i32, i32) {
    %c0_i32 = arith.constant 0 : i32
    %c0_i32_0 = arith.constant 0 : i32
    %c0_i32_1 = arith.constant 0 : i32
    return %c0_i32, %c0_i32_0 : i32, i32
  }
  func.func @transform_5(%arg0: i32) -> (i32, i32) {
    %c0_i32 = arith.constant 0 : i32
    %c0_i32_0 = arith.constant 0 : i32
    %c0_i32_1 = arith.constant 0 : i32
    return %c0_i32, %c0_i32_0 : i32, i32
  }
  func.func @transform_6(%arg0: i32) -> (i32, i32) {
    %c0_i32 = arith.constant 0 : i32
    %c0_i32_0 = arith.constant 0 : i32
    %c0_i32_1 = arith.constant 0 : i32
    return %c0_i32, %c0_i32_0 : i32, i32
  }
  func.func @transform_7(%arg0: i32) -> (i32, i32) {
    %c0_i32 = arith.constant 0 : i32
    %c0_i32_0 = arith.constant 0 : i32
    %c0_i32_1 = arith.constant 0 : i32
    return %c0_i32, %c0_i32_0 : i32, i32
  }
  func.func @transform_8(%arg0: i32) -> (i32, i32) {
    %c0_i32 = arith.constant 0 : i32
    %c0_i32_0 = arith.constant 0 : i32
    %c0_i32_1 = arith.constant 0 : i32
    return %c0_i32, %c0_i32_0 : i32, i32
  }
}

</mosaic_0001>

<bundles_post_ra>
// kernel: tile.10
= control target key start
LH: loop header
LB: loop body
LE: loop exit
PB: predicated region body
PF: predicated region fallthrough
CT: control target
= control target key end

     0   :  { %s154_s0 = inlined_call_operand.vmem [shape: f32[8,8], index: 0, kind: input, shape index: {}]   ;;  %s155_s1 = inlined_call_operand.vmem [shape: f32[2,8,6,8], index: 1, kind: output, shape index: {}]  }
   0x1   :  { %v4_v0 = vld [vmem:[%s154_s0] ss:$0 sm:$0xff]  ;;  %v51_v1 = vld [vmem:[%s154_s0 + $0x1] ss:$0 sm:$0xff]  ;;  %v54_v2 = vld [vmem:[%s154_s0 + $0x2] ss:$0 sm:$0xff] }
   0x2   :  { %5 = vst [vmem:[%s155_s1] sm:$0xff] %v4_v0  ;;  %v57_v3 = vld [vmem:[%s154_s0 + $0x3] ss:$0 sm:$0xff]  ;;  %v60_v4 = vld [vmem:[%s154_s0 + $0x4] ss:$0 sm:$0xff]  ;;  %v63_v5 = vld [vmem:[%s154_s0 + $0x5] ss:$0 sm:$0xff] }
   0x3   :  { %50 = vst [vmem:[%s155_s1 + $0x40] sm:$0xff] %v4_v0  ;;  %v66_v6 = vld [vmem:[%s154_s0 + $0x6] ss:$0 sm:$0xff]  ;;  %v69_v7 = vld [vmem:[%s154_s0 + $0x7] ss:$0 sm:$0xff] }
   0x4   :  { %52 = vst [vmem:[%s155_s1 + $0x8] sm:$0xff] %v51_v1 }
   0x5   :  { %53 = vst [vmem:[%s155_s1 + $0x48] sm:$0xff] %v51_v1 }
   0x6   :  { %55 = vst [vmem:[%s155_s1 + $0x10] sm:$0xff] %v54_v2 }
   0x7   :  { %56 = vst [vmem:[%s155_s1 + $0x50] sm:$0xff] %v54_v2 }
   0x8   :  { %58 = vst [vmem:[%s155_s1 + $0x18] sm:$0xff] %v57_v3 }
   0x9   :  { %59 = vst [vmem:[%s155_s1 + $0x58] sm:$0xff] %v57_v3 }
   0xa   :  { %61 = vst [vmem:[%s155_s1 + $0x20] sm:$0xff] %v60_v4 }
   0xb   :  { %62 = vst [vmem:[%s155_s1 + $0x60] sm:$0xff] %v60_v4 }
   0xc   :  { %64 = vst [vmem:[%s155_s1 + $0x28] sm:$0xff] %v63_v5 }
   0xd   :  { %65 = vst [vmem:[%s155_s1 + $0x68] sm:$0xff] %v63_v5 }
   0xe   :  { %67 = vst [vmem:[%s155_s1 + $0x30] sm:$0xff] %v66_v6 }
   0xf   :  { %68 = vst [vmem:[%s155_s1 + $0x70] sm:$0xff] %v66_v6 }
  0x10   :  { %70 = vst [vmem:[%s155_s1 + $0x38] sm:$0xff] %v69_v7 }
  0x11   :  { %71 = vst [vmem:[%s155_s1 + $0x78] sm:$0xff] %v69_v7 }

// kernel: tile.11
= control target key start
LH: loop header
LB: loop body
LE: loop exit
PB: predicated region body
PF: predicated region fallthrough
CT: control target
= control target key end

     0   :  { %vm4_vm0 = vcmask 1047556   ;;  %s155_s14 = smov 40   ;;  %s156_s15 = smov 32   ;;  %vm6_vm1 = vcmask 64512   ;;  %vm25_vm2 = vcmask 392512   ;;  %vm46_vm3 = vcmask 326912   ;;  %s290_s0 = inlined_call_operand.vmem [shape: f32[2,8,6,8], index: 0, kind: input, shape index: {}]   ;;  %s291_s1 = inlined_call_operand.vmem [shape: f32[16,48], index: 1, kind: output, shape index: {}]  }
   0x1   :  { %v125_v0 = vld [vmem:[%s290_s0 + $0x5] ss:$8 sm:$0xf]   ;;  %v130_v3 = vld [vmem:[%s290_s0 + $0x4] ss:$8 sm:$0xf]  }
   0x2   :  { %v126_v1 = vld [vmem:[%s290_s0 + $0x5] ss:$8 sm:$0xf0]   ;;  %v131_v4 = vld [vmem:[%s290_s0 + $0x4] ss:$8 sm:$0xf0]  }
   0x3   :  { %v22_v2 = vsel %vm4_vm0, %v126_v1, %v125_v0  ;;  %v43_v5 = vsel %vm4_vm0, %v131_v4, %v130_v3  ;;  %v127_v6 = vld [vmem:[%s290_s0 + $0x45] ss:$8 sm:$0xf]   ;;  %v132_v8 = vld [vmem:[%s290_s0 + $0x44] ss:$8 sm:$0xf]  }
   0x4   :  { %23 = vrot.lane.b32.xlu0 %v22_v2, %s155_s14  ;;  %44 = vrot.lane.b32.xlu1 %v43_v5, %s156_s15  ;;  %v128_v7 = vld [vmem:[%s290_s0 + $0x45] ss:$8 sm:$0xf0]   ;;  %v133_v9 = vld [vmem:[%s290_s0 + $0x44] ss:$8 sm:$0xf0]  }
   0x5   :  { %v32_v10 = vsel %vm4_vm0, %v128_v7, %v127_v6  ;;  %v135_v11 = vld [vmem:[%s290_s0 + $0x3] ss:$8 sm:$0xf]   ;;  %v53_v12 = vsel %vm4_vm0, %v133_v9, %v132_v8  ;;  %s157_s28 = smov 24   ;;  %s158_s12 = smov 16   ;;  %vm67_vm4 = vcmask 261312  }
   0x6   :  { %v136_v13 = vld [vmem:[%s290_s0 + $0x3] ss:$8 sm:$0xf0]   ;;  %v140_v15 = vld [vmem:[%s290_s0 + $0x2] ss:$8 sm:$0xf]  }
   0x7   :  { %v64_v14 = vsel %vm4_vm0, %v136_v13, %v135_v11  ;;  %v141_v16 = vld [vmem:[%s290_s0 + $0x2] ss:$8 sm:$0xf0]   ;;  %v137_v17 = vld [vmem:[%s290_s0 + $0x43] ss:$8 sm:$0xf]  }
   0x8   :  { %65 = vrot.lane.b32.xlu2 %v64_v14, %s157_s28  ;;  %v138_v18 = vld [vmem:[%s290_s0 + $0x43] ss:$8 sm:$0xf0]   ;;  %v142_v19 = vld [vmem:[%s290_s0 + $0x42] ss:$8 sm:$0xf]   ;;  %v85_v21 = vsel %vm4_vm0, %v141_v16, %v140_v15 }
   0x9   :  { %v143_v20 = vld [vmem:[%s290_s0 + $0x42] ss:$8 sm:$0xf0]   ;;  %v74_v22 = vsel %vm4_vm0, %v138_v18, %v137_v17  ;;  %v147_v24 = vld [vmem:[%s290_s0 + $0x41] ss:$8 sm:$0xf]  }
   0xa   :  { %v95_v23 = vsel %vm4_vm0, %v143_v20, %v142_v19  ;;  %v148_v25 = vld [vmem:[%s290_s0 + $0x41] ss:$8 sm:$0xf0]   ;;  %s159_s21 = smov 8   ;;  %vm88_vm5 = vcmask 195712   ;;  %vm109_vm6 = vcmask 130112  }
   0xb   :  { %v145_v26 = vld [vmem:[%s290_s0 + $0x1] ss:$8 sm:$0xf]   ;;  %v116_v28 = vsel %vm4_vm0, %v148_v25, %v147_v24  ;;  %v2_v30 = vld [vmem:[%s290_s0] ss:$8 sm:$0xf]  }
   0xc   :  { %33 = vrot.lane.b32.xlu0 %v32_v10, %s155_s14  ;;  %54 = vrot.lane.b32.xlu1 %v53_v12, %s156_s15  ;;  %v146_v27 = vld [vmem:[%s290_s0 + $0x1] ss:$8 sm:$0xf0]   ;;  %v3_v31 = vld [vmem:[%s290_s0] ss:$8 sm:$0xf0]  }
   0xd   :  { %v106_v29 = vsel %vm4_vm0, %v146_v27, %v145_v26  ;;  %v5_v32 = vsel %vm4_vm0, %v3_v31, %v2_v30  ;;  %v122_v33 = vld [vmem:[%s290_s0 + $0x40] ss:$8 sm:$0xf]  }
   0xe   :  { %7 = vst.msk [vmem:[%s291_s1] sm:$0xff] %vm6_vm1, %v5_v32   ;;  %v123_v34 = vld [vmem:[%s290_s0 + $0x40] ss:$8 sm:$0xf0]  }
   0xf   :  { %v13_v35 = vsel %vm4_vm0, %v123_v34, %v122_v33 }
  0x10   :  { %75 = vrot.lane.b32.xlu2 %v74_v22, %s157_s28  ;;  %124 = vst.msk [vmem:[%s291_s1 + $0x8] sm:$0xff] %vm6_vm1, %v13_v35  }
  0x14   :  { %86 = vrot.lane.b32.xlu0 %v85_v21, %s158_s12  ;;  %96 = vrot.lane.b32.xlu1 %v95_v23, %s158_s12 }
  0x18   :  { %107 = vrot.lane.b32.xlu2 %v106_v29, %s159_s21 }
  0x1c   :  { %117 = vrot.lane.b32.xlu0 %v116_v28, %s159_s21 }
  0x62   :  { %v66_v36 = vpop.permute.xlu2 %65  }
  0x6a   :  { %v76_v37 = vpop.permute.xlu2 %75  }
  0x72   :  { %v108_v39 = vpop.permute.xlu2 %107  }
  0x76   :  { %v24_v38 = vpop.permute.xlu0 %23   ;;  %v45_v40 = vpop.permute.xlu1 %44  }
  0x77   :  { %26 = vst.msk [vmem:[%s291_s1] sm:$0xff] %vm25_vm2, %v24_v38  }
  0x78   :  { %47 = vst.msk [vmem:[%s291_s1] sm:$0xff] %vm46_vm3, %v45_v40  }
  0x79   :  { %68 = vst.msk [vmem:[%s291_s1] sm:$0xff] %vm67_vm4, %v66_v36  }
  0x7e   :  { %v34_v41 = vpop.permute.xlu0 %33   ;;  %v55_v42 = vpop.permute.xlu1 %54  }
  0x7f   :  { %129 = vst.msk [vmem:[%s291_s1 + $0x8] sm:$0xff] %vm25_vm2, %v34_v41  }
  0x80   :  { %134 = vst.msk [vmem:[%s291_s1 + $0x8] sm:$0xff] %vm46_vm3, %v55_v42  }
  0x81   :  { %139 = vst.msk [vmem:[%s291_s1 + $0x8] sm:$0xff] %vm67_vm4, %v76_v37  }
  0x86   :  { %v87_v43 = vpop.permute.xlu0 %86   ;;  %v97_v44 = vpop.permute.xlu1 %96  }
  0x87   :  { %89 = vst.msk [vmem:[%s291_s1] sm:$0xff] %vm88_vm5, %v87_v43  }
  0x88   :  { %144 = vst.msk [vmem:[%s291_s1 + $0x8] sm:$0xff] %vm88_vm5, %v97_v44  }
  0x89   :  { %110 = vst.msk [vmem:[%s291_s1] sm:$0xff] %vm109_vm6, %v108_v39  }
  0x8e   :  { %v118_v45 = vpop.permute.xlu0 %117  }
  0x8f   :  { %149 = vst.msk [vmem:[%s291_s1 + $0x8] sm:$0xff] %vm109_vm6, %v118_v45  }

// kernel: attention_forward.1
= control target key start
LH: loop header
LB: loop body
LE: loop exit
PB: predicated region body
PF: predicated region fallthrough
CT: control target
= control target key end

     0   :  { %14 = vsyncpa [#allocation3], 0  ;;  %s1143_s0 = inlined_call_operand.vmem [shape: f32[16,32], index: 0, kind: input, shape index: {}]   ;;  %s1144_s1 = inlined_call_operand.vmem [shape: f32[16,48], index: 1, kind: input, shape index: {}]   ;;  %s1145_s2 = inlined_call_operand.vmem [shape: f32[16,48], index: 2, kind: input, shape index: {}]   ;;  %s1146_s3 = inlined_call_operand.vmem [shape: f32[32,64], index: 3, kind: input, shape index: {}]   ;;  %s1147_s4 = inlined_call_operand.vmem [shape: f32[1,64], index: 4, kind: input, shape index: {}]   ;;  %s1148_s5 = inlined_call_operand.vmem [shape: f32[32,32], index: 5, kind: input, shape index: {}]   ;;  %s1149_s6 = inlined_call_operand.vmem [shape: f32[1,32], index: 6, kind: input, shape index: {}]   ;;  %s1150_s7 = inlined_call_operand.hbm [shape: f32[16,32], index: 7, kind: output, shape index: {0}]   ;;  %s1151_s8 = inlined_call_operand.hbm [shape: f32[64,8], index: 8, kind: output, shape index: {1}]  }
   0x1   :  { %v35_v0 = vld [vmem:[%s1146_s3 + $0x18] sm:$0xff]  ;;  %v34_v1 = vld [vmem:[%s1146_s3 + $0x10] sm:$0xff]  ;;  %v33_v2 = vld [vmem:[%s1146_s3 + $0x8] sm:$0xff] }
   0x2   :  { %59 = vmatpush.msra.mxu0 %v35_v0 }
   0x3   :  { %15 = vsyncpa [#allocation5], 0  ;;  %v32_v3 = vld [vmem:[%s1146_s3] sm:$0xff]  ;;  %vm40_vm0 = vcmask 261120   ;;  %s872_s17 = smov 48   ;;  %vm85_vm1 = vcmask 1047936   ;;  %v70_v14 = vlaneseq }
   0x4   :  { %60 = vmatpush.msra.mxu0 %v34_v1  ;;  %v30_v4 = vld [vmem:[%s1143_s0] sm:$0xff]  ;;  %v31_v10 = vld [vmem:[%s1143_s0 + $0x8] sm:$0xff]  ;;  %s874_s19 = smov 84   ;;  %s875_s23 = smov 96   ;;  %vm165_vm3 = vcmask 64512  }
   0x5   :  { %v786_v5 = vld [vmem:[%s1147_s4] ss:$0 sm:$0xff]  ;;  %s873_s4 = smov 124   ;;  %v966_v15 = vand.u32 127, %v70_v14  ;;  %v131_v32 = vshrl.u32 %v70_v14, 7  ;;  %s876_s24 = smov 120  }
   0x6   :  { %61 = vmatpush.msra.mxu0 %v33_v2  ;;  %v122_v19 = vld [vmem:[%s1145_s2] sm:$0xff]  ;;  %s877_s25 = smov 80   ;;  %v119_v43 = vld [vmem:[%s1144_s1 + $0x8] sm:$0xff]  ;;  %s878_s30 = smov 88  }
   0x7   :  { %v76_v17 = vand.u32 7, %v966_v15  ;;  %v118_v20 = vld [vmem:[%s1144_s1] sm:$0xff]  ;;  %v137_v33 = vand.u32 7, %v131_v32  ;;  %v123_v44 = vld [vmem:[%s1145_s2 + $0x8] sm:$0xff]  ;;  %s879_s1 = smov 112   ;;  %v132_v57 = vadd.s32 8, %v131_v32 }
   0x8   :  { %62 = vmatpush.msra.mxu0 %v32_v3  ;;  %s880_s2 = smov 72   ;;  %s881_s9 = smov 8  }
   0x9   :  { %745 = vmatmul.msk.f32.vlgmr.msra.gmra.mxu0 %vm40_vm0, %v30_v4  ;;  %vm969_vm2 = vcmp.lt.s32.totalorder %v76_v17, 4  ;;  %vm997_vm4 = vcmp.gt.s32.totalorder %v966_v15, %v137_v33  ;;  %v144_v58 = vand.u32 7, %v132_v57  ;;  %s882_s10 = smov 16   ;;  %s883_s11 = smov 24  }
   0xa   :  { %s884_s0 = smov [#allocation4]   ;;  %s885_s21 = smov 128  }
   0xb   :  { %vm1020_vm5 = vcmp.gt.s32.totalorder %v966_v15, %v144_v58  ;;  %s726_s20 = sshll.u32 %s884_s0, 4  ;;  %s727_s20 = int_to_ptr.vmem [resolvable:$true] %s726_s20 }
  0x11   :  { %746 = vmatmul.msk.f32.gmra.mxu0 %vm40_vm0, %v31_v10 }
  0x86   :  { %v64_v6 = vpop.f32.mrf.mxu0 }
  0x87   :  { %v951_v7 = vadd.f32 %v786_v5, %v64_v6 }
  0x89   :  { %86 = vrot.lane.b32.xlu0 %v951_v7, %s872_s17  ;;  %v120_v24 = vmul.f32 %v118_v20, %v951_v7 }
  0x8e   :  { %v67_v26 = vpop.f32.mrf.mxu0 }
  0x8f   :  { %v983_v27 = vadd.f32 %v786_v5, %v67_v26 }
  0x91   :  { %v121_v47 = vmul.f32 %v119_v43, %v983_v27 }
  0xfb   :  { %v87_v8 = vpop.permute.xlu0 %86 }
  0xfc   :  { %v88_v9 = vsel %vm85_vm1, %v87_v8, %v951_v7 }
  0xfd   :  { %92 = vrot.lane.b32.xlu0 %v88_v9, %s872_s17 }
 0x16f   :  { %v93_v11 = vpop.permute.xlu0 %92 }
 0x170   :  { %v96_v12 = vsel %vm85_vm1, %v93_v11, %v951_v7 }
 0x171   :  { %v98_v13 = vsub.f32 0.0, %v96_v12 }
 0x173   :  { %102 = vrot.lane.b32.xlu1 %v98_v13, %s873_s4 }
 0x17b   :  { %110 = vrot.lane.b32.xlu1 %v96_v12, %s874_s19 }
 0x1e5   :  { %v103_v16 = vpop.permute.xlu1 %102 }
 0x1ed   :  { %v111_v21 = vpop.permute.xlu1 %110 }
 0x1ee   :  { %v116_v22 = vsel %vm969_vm2, %v103_v16, %v111_v21 }
 0x1ef   :  { %v124_v23 = vmul.f32 %v122_v19, %v116_v22 }
 0x1f1   :  { %v126_v25 = vadd.f32 %v124_v23, %v120_v24 }
 0x1f3   :  { %163 = vrot.lane.b32.xlu2 %v126_v25, %s875_s23  ;;  %v128_v29 = vmul.f32 0.35355338, %v126_v25 }
 0x1fb   :  { %89 = vrot.lane.b32.xlu2 %v983_v27, %s872_s17 }
 0x24d   :  { %v164_v28 = vpop.permute.xlu2 %163 }
 0x24e   :  { %747 = vmatpush.xpose.msk.msra.mxu1 %vm165_vm3, %v164_v28  ;;  %769 = vmatpush.xpose.msk.msra.mxu3 %vm165_vm3, %v164_v28 }
 0x251   :  { %748 = vmatmul.msk.f32.vlgmr.msra.gmra.mxu1 %vm165_vm3, %v128_v29 }
 0x255   :  { %v90_v30 = vpop.permute.xlu2 %89 }
 0x256   :  { %v91_v31 = vsel %vm85_vm1, %v90_v30, %v983_v27 }
 0x257   :  { %94 = vrot.lane.b32.xlu0 %v91_v31, %s872_s17 }
 0x2c9   :  { %v95_v34 = vpop.permute.xlu0 %94 }
 0x2ca   :  { %v97_v35 = vsel %vm85_vm1, %v95_v34, %v983_v27 }
 0x2cb   :  { %112 = vrot.lane.b32.xlu0 %v97_v35, %s874_s19  ;;  %v99_v36 = vsub.f32 0.0, %v97_v35  ;;  %s728_s19 = sshll.u32 %s1151_s8, 4  ;;  %s715_s8 = sshll.u32 %s1150_s7, 4  ;;  %s729_s19 = int_to_ptr.hbm [resolvable:$true] %s728_s19  ;;  %s716_s8 = int_to_ptr.hbm [resolvable:$true] %s715_s8 }
 0x2cd   :  { %104 = vrot.lane.b32.xlu2 %v99_v36, %s873_s4 }
 0x2ce   :  { %v189_v38 = vpop.f32.mrf.mxu1 }
 0x2cf   :  { %v195_v39 = vsel %vm997_vm4, %v189_v38, -1e+09 }
 0x2d0   :  { %v197_v40 = vsel %vm165_vm3, %v195_v39, -inf }
 0x2d1   :  { %198 = vmax.xlane.f32.xlu1 %v197_v40 }
 0x2d5   :  { %160 = vrot.lane.b32.xlu2 %v128_v29, %s876_s24 }
 0x2ea   :  { %246 = vrot.lane.b32.xlu1 %v951_v7, %s877_s25 }
 0x327   :  { %v105_v41 = vpop.permute.xlu2 %104 }
 0x32f   :  { %v161_v42 = vpop.permute.xlu2 %160 }
 0x330   :  { %749 = vmatmul.msk.f32.vlgmr.msra.gmra.mxu3 %vm165_vm3, %v161_v42 }
 0x33d   :  { %v113_v45 = vpop.permute.xlu0 %112 }
 0x33e   :  { %v117_v46 = vsel %vm969_vm2, %v105_v41, %v113_v45 }
 0x33f   :  { %v125_v48 = vmul.f32 %v123_v44, %v117_v46 }
 0x341   :  { %v127_v49 = vadd.f32 %v125_v48, %v121_v47 }
 0x343   :  { %v129_v50 = vmul.f32 0.35355338, %v127_v49 }
 0x344   :  { %v199_v51 = vpop.xlane.xlu1 %198 }
 0x345   :  { %v203_v52 = vsub.f32 %v195_v39, %v199_v51  ;;  %413 = vrot.lane.b32.xlu0 %v129_v50, %s876_s24  ;;  %s886_s24 = smov [#allocation2]  }
 0x347   :  { %v205_v53 = vmul.f32 1.442695, %v203_v52 }
 0x349   :  { %788 = vpow2.f32 %v205_v53 }
 0x34d   :  { %282 = vrot.lane.b32.xlu0 %v126_v25, %s878_s30 }
 0x34f   :  { %v789_v54 = vpop.eup %788 }
 0x350   :  { %v209_v55 = vsel %vm165_vm3, %v789_v54, 0.0 }
 0x351   :  { %210 = vadd.xlane.f32.xlu2 %v209_v55 }
 0x355   :  { %278 = vrot.lane.b32.xlu0 %v128_v29, %s879_s1 }
 0x35c   :  { %v247_v56 = vpop.permute.xlu1 %246 }
 0x35d   :  { %280 = vrot.lane.b32.xlu0 %v161_v42, %s879_s1  ;;  %270 = vmatpush.msrb.mxu0 %v247_v56 }
 0x35e   :  { %770 = vmatpush.msra.mxu2 %v247_v56 }
 0x365   :  { %416 = vrot.lane.b32.xlu0 %v127_v49, %s875_s23 }
 0x369   :  { %530 = vrot.lane.b32.xlu2 %v129_v50, %s879_s1 }
 0x36d   :  { %534 = vrot.lane.b32.xlu0 %v127_v49, %s878_s30 }
 0x3b3   :  { %v192_v60 = vpop.f32.mrf.mxu3 }
 0x3b4   :  { %v196_v61 = vsel %vm1020_vm5, %v192_v60, -1e+09 }
 0x3b5   :  { %v200_v62 = vsel %vm165_vm3, %v196_v61, -inf }
 0x3b6   :  { %201 = vmax.xlane.f32.xlu1 %v200_v62 }
 0x3b7   :  { %v414_v63 = vpop.permute.xlu0 %413 }
 0x3b8   :  { %532 = vrot.lane.b32.xlu0 %v414_v63, %s879_s1 }
 0x3bf   :  { %v283_v0 = vpop.permute.xlu0 %282 }
 0x3c0   :  { %752 = vmatpush.xpose.msk.msrb.mxu3 %vm165_vm3, %v283_v0 }
 0x3c4   :  { %v211_v1 = vpop.xlane.xlu2 %210 }
 0x3c5   :  { %790 = vrcp.f32 %v211_v1  ;;  %v226_v6 = vand.u32 2147483648, %v211_v1  ;;  %v224_v10 = vand.u32 2147483647, %v211_v1  ;;  %vm220_vm7 = vweird.f32 %v211_v1 }
 0x3c7   :  { %v279_v2 = vpop.permute.xlu0 %278  ;;  %v227_v12 = vor.u32 1.1754944e-38, %v226_v6  ;;  %vm225_vm9 = vcmp.eq.f32.partialorder %v224_v10, 8.507059e+37 }
 0x3c8   :  { %753 = vmatmul.msk.f32.vlgmr.msrb.gmra.mxu3 %vm165_vm3, %v279_v2 }
 0x3cb   :  { %v791_v3 = vpop.eup %790 }
 0x3cc   :  { %v216_v4 = vmul.f32 %v791_v3, %v211_v1  ;;  %vm221_vm6 = vweird.f32 %v791_v3  ;;  %v531_v18 = vpop.permute.xlu2 %530 }
 0x3cd   :  { %vm222_vm8 = vmor %vm220_vm7, %vm221_vm6 }
 0x3ce   :  { %v217_v5 = vsub.f32 1.0, %v216_v4 }
 0x3cf   :  { %v281_v8 = vpop.permute.xlu0 %280 }
 0x3d0   :  { %v218_v9 = vmul.f32 %v791_v3, %v217_v5  ;;  %754 = vmatmul.msk.f32.gmra.mxu3 %vm165_vm3, %v281_v8 }
 0x3d2   :  { %v219_v11 = vadd.f32 %v791_v3, %v218_v9 }
 0x3d4   :  { %v223_v13 = vsel %vm222_vm8, %v791_v3, %v219_v11 }
 0x3d5   :  { %v228_v14 = vsel %vm225_vm9, %v227_v12, %v223_v13 }
 0x3d6   :  { %v243_v15 = vmul.f32 %v789_v54, %v228_v14 }
 0x3d7   :  { %v417_v16 = vpop.permute.xlu0 %416 }
 0x3d8   :  { %750 = vmatmul.msk.f32.vlgmr.msrb.gmra.mxu0 %vm165_vm3, %v243_v15  ;;  %701 = vst.msk [vmem:[#allocation4] sm:$0xff] %vm165_vm3, %v243_v15  ;;  %757 = vmatpush.xpose.msk.msrb.mxu1 %vm165_vm3, %v417_v16 }
 0x3db   :  { %758 = vmatmul.msk.f32.vlgmr.msrb.gmra.mxu1 %vm165_vm3, %v129_v50 }
 0x3df   :  { %v535_v17 = vpop.permute.xlu0 %534 }
 0x3e0   :  { %762 = vmatpush.xpose.msk.msra.mxu0 %vm165_vm3, %v535_v17 }
 0x3e3   :  { %759 = vmatmul.msk.f32.gmra.mxu1 %vm165_vm3, %v414_v63  ;;  %763 = vmatmul.msk.f32.vlgmr.msra.gmra.mxu0 %vm165_vm3, %v531_v18 }
 0x429   :  { %v202_v20 = vpop.xlane.xlu1 %201 }
 0x42a   :  { %v533_v19 = vpop.permute.xlu0 %532  ;;  %v204_v22 = vsub.f32 %v196_v61, %v202_v20 }
 0x42b   :  { %764 = vmatmul.msk.f32.gmra.mxu0 %vm165_vm3, %v533_v19 }
 0x42c   :  { %v207_v25 = vmul.f32 1.442695, %v204_v22 }
 0x42e   :  { %792 = vpow2.f32 %v207_v25 }
 0x434   :  { %v1048_v33 = vpop.eup %792 }
 0x435   :  { %v212_v35 = vsel %vm165_vm3, %v1048_v33, 0.0 }
 0x44b   :  { %v307_v21 = vpop.f32.mrf.mxu3 }
 0x44c   :  { %v313_v23 = vsel %vm997_vm4, %v307_v21, -1e+09 }
 0x44d   :  { %v315_v24 = vsel %vm165_vm3, %v313_v23, -inf }
 0x44e   :  { %316 = vmax.xlane.f32.xlu0 %v315_v24 }
 0x453   :  { %v310_v26 = vpop.f32.mrf.mxu3 }
 0x454   :  { %v314_v28 = vsel %vm1020_vm5, %v310_v26, -1e+09 }
 0x455   :  { %v318_v29 = vsel %vm165_vm3, %v314_v28, -inf  ;;  %v1044_v30 = vpop.f32.mrf.mxu0 }
 0x456   :  { %319 = vmax.xlane.f32.xlu2 %v318_v29 }
 0x458   :  { %v441_v31 = vpop.f32.mrf.mxu1 }
 0x459   :  { %v447_v32 = vsel %vm997_vm4, %v441_v31, -1e+09 }
 0x45a   :  { %v449_v34 = vsel %vm165_vm3, %v447_v32, -inf }
 0x45b   :  { %450 = vmax.xlane.f32.xlu1 %v449_v34 }
 0x45e   :  { %213 = vadd.xlane.f32.xlu2 %v212_v35 }
 0x460   :  { %v444_v36 = vpop.f32.mrf.mxu1  ;;  %v559_v38 = vpop.f32.mrf.mxu0 }
 0x461   :  { %v448_v39 = vsel %vm1020_vm5, %v444_v36, -1e+09  ;;  %v565_v40 = vsel %vm997_vm4, %v559_v38, -1e+09 }
 0x462   :  { %v452_v41 = vsel %vm165_vm3, %v448_v39, -inf  ;;  %v567_v42 = vsel %vm165_vm3, %v565_v40, -inf }
 0x463   :  { %453 = vmax.xlane.f32.xlu1 %v452_v41  ;;  %568 = vmax.xlane.f32.xlu0 %v567_v42 }
 0x4a8   :  { %v562_v43 = vpop.f32.mrf.mxu0 }
 0x4a9   :  { %v566_v44 = vsel %vm1020_vm5, %v562_v43, -1e+09 }
 0x4aa   :  { %v570_v45 = vsel %vm165_vm3, %v566_v44, -inf }
 0x4ab   :  { %571 = vmax.xlane.f32.xlu0 %v570_v45 }
 0x4c1   :  { %v317_v46 = vpop.xlane.xlu0 %316 }
 0x4c2   :  { %v321_v47 = vsub.f32 %v313_v23, %v317_v46 }
 0x4c4   :  { %v323_v48 = vmul.f32 1.442695, %v321_v47 }
 0x4c6   :  { %794 = vpow2.f32 %v323_v48 }
 0x4c9   :  { %v320_v49 = vpop.xlane.xlu2 %319 }
 0x4ca   :  { %v322_v37 = vsub.f32 %v314_v28, %v320_v49 }
 0x4cc   :  { %v1062_v50 = vpop.eup %794  ;;  %v325_v51 = vmul.f32 1.442695, %v322_v37 }
 0x4cd   :  { %v327_v52 = vsel %vm165_vm3, %v1062_v50, 0.0 }
 0x4ce   :  { %796 = vpow2.f32 %v325_v51  ;;  %328 = vadd.xlane.f32.xlu1 %v327_v52  ;;  %v451_v53 = vpop.xlane.xlu1 %450 }
 0x4cf   :  { %v455_v54 = vsub.f32 %v447_v32, %v451_v53 }
 0x4d1   :  { %v457_v55 = vmul.f32 1.442695, %v455_v54  ;;  %v214_v56 = vpop.xlane.xlu2 %213 }
 0x4d2   :  { %798 = vrcp.f32 %v214_v56  ;;  %v240_v6 = vand.u32 2147483648, %v214_v56  ;;  %v238_v9 = vand.u32 2147483647, %v214_v56  ;;  %vm234_vm11 = vweird.f32 %v214_v56 }
 0x4d3   :  { %800 = vpow2.f32 %v457_v55 }
 0x4d4   :  { %v1066_v57 = vpop.eup %796  ;;  %v241_v11 = vor.u32 1.1754944e-38, %v240_v6  ;;  %vm239_vm13 = vcmp.eq.f32.partialorder %v238_v9, 8.507059e+37 }
 0x4d5   :  { %v330_v58 = vsel %vm165_vm3, %v1066_v57, 0.0 }
 0x4d6   :  { %v569_v59 = vpop.xlane.xlu0 %568  ;;  %331 = vadd.xlane.f32.xlu0 %v330_v58  ;;  %v454_v60 = vpop.xlane.xlu1 %453 }
 0x4d7   :  { %v573_v61 = vsub.f32 %v565_v40, %v569_v59  ;;  %v456_v62 = vsub.f32 %v448_v39, %v454_v60 }
 0x4d8   :  { %v799_v63 = vpop.eup %798 }
 0x4d9   :  { %v1070_v0 = vpop.eup %800  ;;  %v230_v1 = vmul.f32 %v799_v63, %v214_v56  ;;  %v575_v2 = vmul.f32 1.442695, %v573_v61  ;;  %v459_v3 = vmul.f32 1.442695, %v456_v62  ;;  %vm235_vm10 = vweird.f32 %v799_v63 }
 0x4da   :  { %v461_v4 = vsel %vm165_vm3, %v1070_v0, 0.0  ;;  %vm236_vm12 = vmor %vm234_vm11, %vm235_vm10 }
 0x4db   :  { %v231_v5 = vsub.f32 1.0, %v230_v1  ;;  %802 = vpow2.f32 %v575_v2  ;;  %462 = vadd.xlane.f32.xlu2 %v461_v4 }
 0x4dc   :  { %804 = vpow2.f32 %v459_v3 }
 0x4dd   :  { %v232_v8 = vmul.f32 %v799_v63, %v231_v5 }
 0x4df   :  { %v233_v10 = vadd.f32 %v799_v63, %v232_v8 }
 0x4e1   :  { %v1074_v12 = vpop.eup %802  ;;  %v237_v13 = vsel %vm236_vm12, %v799_v63, %v233_v10 }
 0x4e2   :  { %v1076_v14 = vpop.eup %804  ;;  %v579_v15 = vsel %vm165_vm3, %v1074_v12, 0.0  ;;  %v242_v16 = vsel %vm239_vm13, %v241_v11, %v237_v13 }
 0x4e3   :  { %580 = vadd.xlane.f32.xlu1 %v579_v15  ;;  %v464_v17 = vsel %vm165_vm3, %v1076_v14, 0.0  ;;  %v244_v18 = vmul.f32 %v1048_v33, %v242_v16 }
 0x4e4   :  { %465 = vadd.xlane.f32.xlu2 %v464_v17 }
 0x4e5   :  { %751 = vmatmul.msk.f32.vlgmr.msra.gmra.mxu2 %vm165_vm3, %v244_v18  ;;  %702 = vst.msk [vmem:[#allocation4 + $0x8] sm:$0xff] %vm165_vm3, %v244_v18 }
 0x4ea   :  { %363 = vrot.lane.b32.xlu0 %v951_v7, %s880_s2 }
 0x4fc   :  { %498 = vrot.lane.b32.xlu2 %v983_v27, %s877_s25  ;;  %s713_s25 = sshll.u32 %s886_s24, 4  ;;  %s714_s25 = int_to_ptr.vmem [resolvable:$true] %s713_s25 }
 0x51e   :  { %v572_v19 = vpop.xlane.xlu0 %571 }
 0x51f   :  { %v574_v20 = vsub.f32 %v566_v44, %v572_v19 }
 0x521   :  { %v577_v21 = vmul.f32 1.442695, %v574_v20 }
 0x523   :  { %806 = vpow2.f32 %v577_v21 }
 0x529   :  { %v1088_v22 = vpop.eup %806 }
 0x52a   :  { %v582_v23 = vsel %vm165_vm3, %v1088_v22, 0.0 }
 0x52b   :  { %583 = vadd.xlane.f32.xlu1 %v582_v23 }
 0x541   :  { %v329_v24 = vpop.xlane.xlu1 %328 }
 0x542   :  { %808 = vrcp.f32 %v329_v24  ;;  %v344_v29 = vand.u32 2147483648, %v329_v24  ;;  %v342_v32 = vand.u32 2147483647, %v329_v24  ;;  %vm338_vm15 = vweird.f32 %v329_v24 }
 0x544   :  { %615 = vrot.lane.b32.xlu1 %v983_v27, %s880_s2  ;;  %v345_v36 = vor.u32 1.1754944e-38, %v344_v29  ;;  %vm343_vm2 = vcmp.eq.f32.partialorder %v342_v32, 8.507059e+37 }
 0x548   :  { %v809_v25 = vpop.eup %808 }
 0x549   :  { %v334_v26 = vmul.f32 %v809_v25, %v329_v24  ;;  %v332_v7 = vpop.xlane.xlu0 %331  ;;  %vm339_vm14 = vweird.f32 %v809_v25 }
 0x54a   :  { %810 = vrcp.f32 %v332_v7  ;;  %vm340_vm1 = vmor %vm338_vm15, %vm339_vm14  ;;  %v358_v44 = vand.u32 2147483648, %v332_v7  ;;  %v356_v48 = vand.u32 2147483647, %v332_v7  ;;  %vm352_vm5 = vweird.f32 %v332_v7 }
 0x54b   :  { %v335_v28 = vsub.f32 1.0, %v334_v26 }
 0x54c   :  { %v359_v52 = vor.u32 1.1754944e-38, %v358_v44  ;;  %vm357_vm8 = vcmp.eq.f32.partialorder %v356_v48, 8.507059e+37  ;;  %v663_v44 = vld [vmem:[%s1148_s5 + $0x8] sm:$0xff] }
 0x54d   :  { %v336_v31 = vmul.f32 %v809_v25, %v335_v28 }
 0x54e   :  { %v463_v33 = vpop.xlane.xlu2 %462 }
 0x54f   :  { %v337_v34 = vadd.f32 %v809_v25, %v336_v31  ;;  %812 = vrcp.f32 %v463_v33  ;;  %v478_v37 = vand.u32 2147483648, %v463_v33  ;;  %vm472_vm9 = vweird.f32 %v463_v33 }
 0x550   :  { %v811_v35 = vpop.eup %810 }
 0x551   :  { %v348_v38 = vmul.f32 %v811_v35, %v332_v7  ;;  %v341_v39 = vsel %vm340_vm1, %v809_v25, %v337_v34  ;;  %vm353_vm4 = vweird.f32 %v811_v35  ;;  %v479_v60 = vor.u32 1.1754944e-38, %v478_v37 }
 0x552   :  { %v346_v27 = vsel %vm343_vm2, %v345_v36, %v341_v39  ;;  %vm354_vm7 = vmor %vm352_vm5, %vm353_vm4 }
 0x553   :  { %v349_v40 = vsub.f32 1.0, %v348_v38  ;;  %v361_v41 = vmul.f32 %v1062_v50, %v346_v27  ;;  %v476_v50 = vand.u32 2147483647, %v463_v33 }
 0x555   :  { %v813_v42 = vpop.eup %812  ;;  %v350_v43 = vmul.f32 %v811_v35, %v349_v40  ;;  %703 = vst.msk [vmem:[#allocation4 + $0x10] sm:$0xff] %vm165_vm3, %v361_v41  ;;  %vm477_vm11 = vcmp.eq.f32.partialorder %v476_v50, 8.507059e+37 }
 0x556   :  { %v468_v45 = vmul.f32 %v813_v42, %v463_v33  ;;  %v581_v46 = vpop.xlane.xlu1 %580  ;;  %vm473_vm6 = vweird.f32 %v813_v42 }
 0x557   :  { %v466_v47 = vpop.xlane.xlu2 %465  ;;  %814 = vrcp.f32 %v581_v46  ;;  %v351_v51 = vadd.f32 %v811_v35, %v350_v43  ;;  %vm474_vm10 = vmor %vm472_vm9, %vm473_vm6  ;;  %v596_v9 = vand.u32 2147483648, %v581_v46  ;;  %vm590_vm14 = vweird.f32 %v581_v46  ;;  %v664_v43 = vld [vmem:[%s1148_s5 + $0x10] sm:$0xff] }
 0x558   :  { %v469_v49 = vsub.f32 1.0, %v468_v45  ;;  %816 = vrcp.f32 %v466_v47  ;;  %v492_v10 = vand.u32 2147483648, %v466_v47  ;;  %v490_v15 = vand.u32 2147483647, %v466_v47  ;;  %v662_v45 = vld [vmem:[%s1148_s5] sm:$0xff] }
 0x559   :  { %v355_v54 = vsel %vm354_vm7, %v811_v35, %v351_v51  ;;  %vm486_vm15 = vweird.f32 %v466_v47  ;;  %v597_v17 = vor.u32 1.1754944e-38, %v596_v9 }
 0x55a   :  { %v470_v53 = vmul.f32 %v813_v42, %v469_v49  ;;  %v360_v58 = vsel %vm357_vm8, %v359_v52, %v355_v54  ;;  %vm491_vm5 = vcmp.eq.f32.partialorder %v490_v15, 8.507059e+37 }
 0x55b   :  { %v362_v61 = vmul.f32 %v1066_v57, %v360_v58  ;;  %v594_v57 = vand.u32 2147483647, %v581_v46 }
 0x55c   :  { %v471_v55 = vadd.f32 %v813_v42, %v470_v53  ;;  %v364_v56 = vpop.permute.xlu0 %363 }
 0x55d   :  { %v815_v59 = vpop.eup %814  ;;  %387 = vmatpush.msrb.mxu2 %v364_v56  ;;  %704 = vst.msk [vmem:[#allocation4 + $0x18] sm:$0xff] %vm165_vm3, %v362_v61  ;;  %vm595_vm2 = vcmp.eq.f32.partialorder %v594_v57, 8.507059e+37 }
 0x55e   :  { %v817_v62 = vpop.eup %816  ;;  %v475_v63 = vsel %vm474_vm10, %v813_v42, %v471_v55  ;;  %v586_v1 = vmul.f32 %v815_v59, %v581_v46  ;;  %755 = vmatmul.msk.f32.vlgmr.msrb.gmra.mxu2 %vm165_vm3, %v361_v41  ;;  %vm591_vm12 = vweird.f32 %v815_v59  ;;  %vm408_vm10 = vcmask 130048  }
 0x55f   :  { %v480_v2 = vsel %vm477_vm11, %v479_v60, %v475_v63  ;;  %v482_v3 = vmul.f32 %v817_v62, %v466_v47  ;;  %v499_v4 = vpop.permute.xlu2 %498  ;;  %vm487_vm13 = vweird.f32 %v817_v62  ;;  %vm592_vm1 = vmor %vm590_vm14, %vm591_vm12  ;;  %vm410_vm11 = vcmask 195584  }
 0x560   :  { %v587_v5 = vsub.f32 1.0, %v586_v1  ;;  %522 = vmatpush.msra.mxu3 %v499_v4  ;;  %v495_v6 = vmul.f32 %v1070_v0, %v480_v2  ;;  %v493_v0 = vor.u32 1.1754944e-38, %v492_v10  ;;  %vm488_vm4 = vmor %vm486_vm15, %vm487_vm13 }
 0x561   :  { %v483_v8 = vsub.f32 1.0, %v482_v3 }
 0x562   :  { %v588_v11 = vmul.f32 %v815_v59, %v587_v5  ;;  %760 = vmatmul.msk.f32.vlgmr.msra.gmra.mxu3 %vm165_vm3, %v495_v6  ;;  %705 = vst.msk [vmem:[#allocation4 + $0x20] sm:$0xff] %vm165_vm3, %v495_v6 }
 0x563   :  { %v484_v13 = vmul.f32 %v817_v62, %v483_v8 }
 0x564   :  { %v589_v16 = vadd.f32 %v815_v59, %v588_v11 }
 0x565   :  { %v485_v18 = vadd.f32 %v817_v62, %v484_v13 }
 0x566   :  { %v593_v19 = vsel %vm592_vm1, %v815_v59, %v589_v16  ;;  %756 = vmatmul.msk.f32.gmra.mxu2 %vm165_vm3, %v362_v61 }
 0x567   :  { %v598_v20 = vsel %vm595_vm2, %v597_v17, %v593_v19  ;;  %v489_v21 = vsel %vm488_vm4, %v817_v62, %v485_v18 }
 0x568   :  { %v275_v23 = vpop.f32.mrf.mxu2  ;;  %v494_v24 = vsel %vm491_vm5, %v493_v0, %v489_v21  ;;  %v613_v25 = vmul.f32 %v1074_v12, %v598_v20 }
 0x569   :  { %396 = vrot.lane.b32.xlu0 %v275_v23, %s881_s9  ;;  %v496_v26 = vmul.f32 %v1076_v14, %v494_v24 }
 0x56a   :  { %707 = vst.msk [vmem:[#allocation4 + $0x30] sm:$0xff] %vm165_vm3, %v613_v25 }
 0x56b   :  { %761 = vmatmul.msk.f32.gmra.mxu3 %vm165_vm3, %v496_v26  ;;  %706 = vst.msk [vmem:[#allocation4 + $0x28] sm:$0xff] %vm165_vm3, %v496_v26 }
 0x59e   :  { %v584_v7 = vpop.xlane.xlu1 %583 }
 0x59f   :  { %818 = vrcp.f32 %v584_v7  ;;  %v610_v32 = vand.u32 2147483648, %v584_v7  ;;  %v608_v12 = vand.u32 2147483647, %v584_v7  ;;  %vm604_vm7 = vweird.f32 %v584_v7 }
 0x5a1   :  { %v611_v35 = vor.u32 1.1754944e-38, %v610_v32  ;;  %vm609_vm9 = vcmp.eq.f32.partialorder %v608_v12, 8.507059e+37 }
 0x5a5   :  { %v819_v28 = vpop.eup %818 }
 0x5a6   :  { %v600_v29 = vmul.f32 %v819_v28, %v584_v7  ;;  %vm605_vm6 = vweird.f32 %v819_v28 }
 0x5a7   :  { %vm606_vm8 = vmor %vm604_vm7, %vm605_vm6 }
 0x5a8   :  { %v601_v31 = vsub.f32 1.0, %v600_v29 }
 0x5aa   :  { %v602_v33 = vmul.f32 %v819_v28, %v601_v31 }
 0x5ac   :  { %v603_v34 = vadd.f32 %v819_v28, %v602_v33 }
 0x5ae   :  { %v607_v14 = vsel %vm606_vm8, %v819_v28, %v603_v34 }
 0x5af   :  { %v612_v36 = vsel %vm609_vm9, %v611_v35, %v607_v14 }
 0x5b0   :  { %v614_v38 = vmul.f32 %v1088_v22, %v612_v36  ;;  %v665_v22 = vld [vmem:[%s1148_s5 + $0x18] sm:$0xff] }
 0x5b1   :  { %688 = vmatpush.msra.mxu1 %v665_v22 }
 0x5b2   :  { %708 = vst.msk [vmem:[#allocation4 + $0x38] sm:$0xff] %vm165_vm3, %v614_v38 }
 0x5b3   :  { %689 = vmatpush.msra.mxu1 %v664_v43  ;;  %734 = dma.vmem_to_hbm [thread:$0]  %s727_s20, 1024, %s729_s19, [#allocation5], %s885_s21, %s885_s21, %s881_s9  }
 0x5b5   :  { %690 = vmatpush.msra.mxu1 %v663_v44 }
 0x5b6   :  { %v616_v39 = vpop.permute.xlu1 %615 }
 0x5b7   :  { %639 = vmatpush.msra.mxu2 %v616_v39  ;;  %691 = vmatpush.msra.mxu1 %v662_v45 }
 0x5b8   :  { %765 = vmatmul.msk.f32.vlgmr.msra.gmra.mxu2 %vm165_vm3, %v613_v25 }
 0x5c0   :  { %766 = vmatmul.msk.f32.gmra.mxu2 %vm165_vm3, %v614_v38 }
 0x5db   :  { %v397_v48 = vpop.permute.xlu0 %396 }
 0x5dc   :  { %v407_v49 = vsel %vm165_vm3, %v1044_v30, %v397_v48  ;;  %v787_v30 = vld [vmem:[%s1149_s6] ss:$0 sm:$0xff] }
 0x5e1   :  { %v389_v27 = vpop.f32.mrf.mxu2 }
 0x5e2   :  { %400 = vrot.lane.b32.xlu0 %v389_v27, %s882_s10 }
 0x5e5   :  { %v524_v40 = vpop.f32.mrf.mxu3 }
 0x5e9   :  { %v392_v41 = vpop.f32.mrf.mxu2 }
 0x5ea   :  { %404 = vrot.lane.b32.xlu2 %v392_v41, %s883_s11 }
 0x5ee   :  { %v527_v42 = vpop.f32.mrf.mxu3 }
 0x5ef   :  { %648 = vrot.lane.b32.xlu0 %v527_v42, %s881_s9 }
 0x63b   :  { %v641_v46 = vpop.f32.mrf.mxu2 }
 0x63c   :  { %652 = vrot.lane.b32.xlu1 %v641_v46, %s882_s10 }
 0x643   :  { %v644_v47 = vpop.f32.mrf.mxu2 }
 0x644   :  { %656 = vrot.lane.b32.xlu2 %v644_v47, %s883_s11  ;;  %v405_v51 = vpop.permute.xlu2 %404 }
 0x654   :  { %v401_v37 = vpop.permute.xlu0 %400 }
 0x655   :  { %v409_v52 = vsel %vm408_vm10, %v407_v49, %v401_v37 }
 0x656   :  { %v411_v53 = vsel %vm410_vm11, %v409_v52, %v405_v51 }
 0x657   :  { %767 = vmatmul.msk.f32.vlgmr.msra.gmra.mxu1 %vm40_vm0, %v411_v53 }
 0x661   :  { %v649_v50 = vpop.permute.xlu0 %648 }
 0x662   :  { %v659_v54 = vsel %vm165_vm3, %v524_v40, %v649_v50 }
 0x69e   :  { %v657_v56 = vpop.permute.xlu2 %656 }
 0x6ae   :  { %v653_v55 = vpop.permute.xlu1 %652 }
 0x6af   :  { %v660_v58 = vsel %vm408_vm10, %v659_v54, %v653_v55 }
 0x6b0   :  { %v661_v59 = vsel %vm410_vm11, %v660_v58, %v657_v56 }
 0x6b1   :  { %768 = vmatmul.msk.f32.gmra.mxu1 %vm40_vm0, %v661_v59 }
 0x6d4   :  { %v693_v60 = vpop.f32.mrf.mxu1 }
 0x6d5   :  { %v694_v61 = vadd.f32 %v787_v30, %v693_v60 }
 0x6d7   :  { %699 = vst.msk [vmem:[#allocation2] sm:$0xff] %vm40_vm0, %v694_v61 }
 0x72e   :  { %v696_v62 = vpop.f32.mrf.mxu1 }
 0x72f   :  { %v697_v63 = vadd.f32 %v787_v30, %v696_v62 }
 0x731   :  { %700 = vst.msk [vmem:[#allocation2 + $0x8] sm:$0xff] %vm40_vm0, %v697_v63 }
 0x732   :  { %721 = dma.vmem_to_hbm [thread:$0]  %s714_s25, 256, %s716_s8, [#allocation3], %s885_s21, %s885_s21, %s881_s9  }
 0x733   :  { %868 = dma.done.wait [#allocation3], 256  }
 0x734   :  { %869 = vsyncadd [#allocation3], 4294967040 }
 0x735   :  { %870 = dma.done.wait [#allocation5], 1024  }
 0x736   :  { %871 = vsyncadd [#allocation5], 4294966272 }
 0x737   :  { %743 = vsyncpa [#allocation3], 1 }
 0x738   :  { %744 = vsyncpa [#allocation5], 1 }

</bundles_post_ra>
